<compile_context>
chip_gen: v5e
topology: v5e:2x2
jax: 0.10.0
libtpu: 0.0.40
codegen_flags: <defaults>
</compile_context>

<pallas_src>
import functools

import jax
import jax.numpy as jnp
from jax.experimental import pallas as pl
from jax.experimental.pallas import tpu as pltpu

# Module "parameters" (no learnable weights in LRN). AlexNet-style defaults.
LOCAL_SIZE = 5          # odd, across-channel window
ALPHA = 1e-4
BETA = 0.75

_LANE = 128


def _round_up(v, m):
    return (v + m - 1) // m * m


def _lrn_kernel(band_ref, x_ref, o_ref, *, local_size, alpha, beta):
    # band_ref: (C, C) 0/1 off-diagonal band of the cross-channel window.
    # x_ref/o_ref tile: (1, C, T) -- full channel dim resident, spatial tiled.
    x = x_ref[0]                               # (C, T)
    xf = x.astype(jnp.float32)
    xsq = xf * xf

    pad = (local_size - 1) // 2
    if pad > 0:
        # Windowed channel sum = center tap (exact, VPU) + neighbors via a
        # banded matmul on the otherwise-idle MXU. No concatenate, no
        # sublane-misaligned slices.
        acc = xsq + jnp.dot(band_ref[...], xsq,
                            preferred_element_type=jnp.float32,
                            precision=jax.lax.Precision.HIGHEST)
    else:
        acc = xsq

    # AvgPool3d divides by the full kernel size (count_include_pad=True).
    base = acc * (alpha / float(local_size)) + 1.0

    if beta == 0.75:
        # base**-0.75 = rsqrt(base) * sqrt(rsqrt(base)) -- 2 EUP ops, no divide,
        # no pow (which lowers to exp(log())).
        r = jax.lax.rsqrt(base)                # base ** -0.5
        inv = r * jnp.sqrt(r)                  # base ** -0.75
    else:
        inv = base ** (-beta)                  # generic fallback, still no divide

    o_ref[0] = (xf * inv).astype(o_ref.dtype)


def lrn(x, *, local_size=LOCAL_SIZE, alpha=ALPHA, beta=BETA, tile=1024):
    """x: (N, C, H, W). Returns LRN(x) with same shape/dtype."""
    n, c, h, w = x.shape
    hw = h * w
    itemsize = jnp.dtype(x.dtype).itemsize

    # VMEM-aware tile cap: ~10 live (C, tile) f32-sized buffers (double-buffered
    # in/out + kernel temps) kept under ~20 MiB so we fit the 32 MiB scoped
    # budget on every generation (incl. v7x's 64 MiB physical VMEM).
    budget = 20 * 1024 * 1024
    cap = max(_LANE, (budget // (10 * 4 * c)) // _LANE * _LANE)
    blk = min(tile, cap, _round_up(hw, _LANE))
    blk = max(_LANE, blk // _LANE * _LANE)
    # Keep >= 2 grid steps when possible so both v7x TensorCores get work.
    while n * pl.cdiv(hw, blk) < 2 and blk > _LANE:
        blk = max(_LANE, (blk // 2) // _LANE * _LANE)

    hw_pad = _round_up(hw, blk)                # pad spatial instead of tile=hw fallback
    x2d = x.reshape(n, c, hw)
    if hw_pad != hw:
        x2d = jnp.pad(x2d, ((0, 0), (0, 0), (0, hw_pad - hw)))

    # Constant 0/1 off-diagonal band: band[i, j] = 1 iff 0 < |i - j| <= pad.
    pad_c = (local_size - 1) // 2
    ch = jnp.arange(c)
    band = ((jnp.abs(ch[:, None] - ch[None, :]) <= pad_c)
            & (ch[:, None] != ch[None, :])).astype(jnp.float32)

    kernel = functools.partial(
        _lrn_kernel, local_size=local_size, alpha=alpha, beta=beta)

    grid = (n, hw_pad // blk)
    cost = pl.CostEstimate(
        flops=n * c * hw_pad * (2 * local_size + 8),
        transcendentals=2 * n * c * hw_pad,
        bytes_accessed=2 * n * c * hw_pad * itemsize)

    out = pl.pallas_call(
        kernel,
        out_shape=jax.ShapeDtypeStruct((n, c, hw_pad), x.dtype),
        grid_spec=pltpu.PrefetchScalarGridSpec(
            num_scalar_prefetch=0,
            grid=grid,
            in_specs=[
                pl.BlockSpec((c, c), lambda i, j: (0, 0)),        # band (tiny, const)
                pl.BlockSpec((1, c, blk), lambda i, j: (i, 0, j)),
            ],
            out_specs=pl.BlockSpec((1, c, blk), lambda i, j: (i, 0, j)),
        ),
        compiler_params=pltpu.CompilerParams(
            dimension_semantics=("parallel", "parallel"),
            vmem_limit_bytes=32 * 1024 * 1024),
        cost_estimate=cost,
    )(band, x2d)

    if hw_pad != hw:
        out = out[:, :, :hw]
    return out.reshape(n, c, h, w)


def lrn_reference(x, *, local_size=LOCAL_SIZE, alpha=ALPHA, beta=BETA):
    """Pure-JAX reference mirroring the PyTorch forward (pow + divide)."""
    xf = x.astype(jnp.float32)
    xsq = xf * xf
    pad = (local_size - 1) // 2
    padded = jnp.pad(xsq, ((0, 0), (pad, pad), (0, 0), (0, 0)))
    c = x.shape[1]
    acc = sum(padded[:, k:k + c] for k in range(local_size))
    div = (acc * (alpha / float(local_size)) + 1.0) ** beta
    return (xf / div).astype(x.dtype)


if __name__ == "__main__":
    key = jax.random.PRNGKey(0)

    # Test 1: AlexNet-style LRN (local_size=5, alpha=1e-4, beta=0.75).
    x1 = jax.random.normal(key, (2, 8, 16, 16), dtype=jnp.float32)
    out1 = jax.block_until_ready(lrn(x1, local_size=5, alpha=1e-4, beta=0.75))
    ref1 = lrn_reference(x1, local_size=5, alpha=1e-4, beta=0.75)
    assert out1.shape == x1.shape and out1.dtype == x1.dtype
    assert jnp.allclose(out1, ref1, atol=1e-5, rtol=1e-5), "mismatch (test 1)"

    # Test 2: module-default params (local_size=1, alpha=1.0, beta=0.75) and a
    # ragged spatial size (exercises the lane-padding path).
    x2 = jax.random.normal(jax.random.fold_in(key, 1), (2, 4, 15, 15),
                           dtype=jnp.float32)
    out2 = jax.block_until_ready(lrn(x2, local_size=1, alpha=1.0, beta=0.75))
    ref2 = lrn_reference(x2, local_size=1, alpha=1.0, beta=0.75)
    assert out2.shape == x2.shape and out2.dtype == x2.dtype
    assert jnp.allclose(out2, ref2, atol=1e-5, rtol=1e-5), "mismatch (test 2)"

    print("KERNEL_OK")
</pallas_src>

<mosaic_0001>
module attributes {stable_mosaic.version = 11 : i64} {
  func.func @_lrn_kernel(%arg0: i32, %arg1: i32, %arg2: memref<8x8xf32, #tpu.memory_space<vmem>>, %arg3: memref<1x8x256xf32, #tpu.memory_space<vmem>>, %arg4: memref<1x8x256xf32, #tpu.memory_space<vmem>>) attributes {dimension_semantics = [#tpu.dimension_semantics<parallel>, #tpu.dimension_semantics<parallel>], iteration_bounds = array<i64: 2, 1>, scalar_prefetch = 0 : i64, scratch_operands = 0 : i64, tpu.core_type = #tpu.core_type<tc>, window_params = [{pipeline_mode = #tpu.pipeline_mode<synchronous>, transform_indices = @transform_0, window_bounds = array<i64: 8, 8>}, {transform_indices = @transform_1, window_bounds = array<i64: 1, 8, 256>}, {transform_indices = @transform_2, window_bounds = array<i64: 1, 8, 256>}]} {
    %c0 = arith.constant 0 : index
    %c0_0 = arith.constant 0 : index
    %c0_1 = arith.constant 0 : index
    %0 = vector.load %arg3[%c0, %c0_0, %c0_1] : memref<1x8x256xf32, #tpu.memory_space<vmem>>, vector<1x8x256xf32>
    %1 = vector.shape_cast %0 : vector<1x8x256xf32> to vector<8x256xf32>
    %2 = arith.mulf %1, %1 : vector<8x256xf32>
    %c0_2 = arith.constant 0 : index
    %c0_3 = arith.constant 0 : index
    %3 = vector.load %arg2[%c0_2, %c0_3] : memref<8x8xf32, #tpu.memory_space<vmem>>, vector<8x8xf32>
    %cst = arith.constant dense<0.000000e+00> : vector<8x256xf32>
    %4 = tpu.matmul %3, %2, %cst {dimension_numbers = #tpu.dot_dimension_numbers<[1], [0], [0], [1], [0, 0, 1, 1], [], []>, precision = #tpu.contract_precision<fp32>} : vector<8x8xf32>, vector<8x256xf32>, vector<8x256xf32> -> vector<8x256xf32>
    %5 = arith.addf %2, %4 : vector<8x256xf32>
    %cst_4 = arith.constant 2.000000e-05 : f32
    %6 = vector.broadcast %cst_4 : f32 to vector<8x256xf32>
    %7 = arith.mulf %5, %6 : vector<8x256xf32>
    %cst_5 = arith.constant 1.000000e+00 : f32
    %8 = vector.broadcast %cst_5 : f32 to vector<8x256xf32>
    %9 = arith.addf %7, %8 : vector<8x256xf32>
    %10 = math.rsqrt %9 : vector<8x256xf32>
    %11 = math.sqrt %10 : vector<8x256xf32>
    %12 = arith.mulf %10, %11 : vector<8x256xf32>
    %13 = arith.mulf %1, %12 : vector<8x256xf32>
    %c0_6 = arith.constant 0 : index
    %c0_7 = arith.constant 0 : index
    %c0_8 = arith.constant 0 : index
    %14 = vector.load %arg4[%c0_6, %c0_7, %c0_8] : memref<1x8x256xf32, #tpu.memory_space<vmem>>, vector<1x8x256xf32>
    %15 = vector.shape_cast %14 : vector<1x8x256xf32> to vector<8x256xf32>
    %16 = vector.shape_cast %13 : vector<8x256xf32> to vector<1x8x256xf32>
    tpu.vector_store %arg4[%c0_6, %c0_7, %c0_8], %16 {strides = array<i32>} : memref<1x8x256xf32, #tpu.memory_space<vmem>>, vector<1x8x256xf32>,
    return
  }
  func.func @transform_0(%arg0: i32, %arg1: i32) -> (i32, i32) {
    %c0_i32 = arith.constant 0 : i32
    %c0_i32_0 = arith.constant 0 : i32
    %c0_i32_1 = arith.constant 0 : i32
    return %c0_i32, %c0_i32_0 : i32, i32
  }
  func.func @transform_1(%arg0: i32, %arg1: i32) -> (i32, i32, i32) {
    %c0_i32 = arith.constant 0 : i32
    %c0_i32_0 = arith.constant 0 : i32
    return %arg0, %c0_i32, %arg1 : i32, i32, i32
  }
  func.func @transform_2(%arg0: i32, %arg1: i32) -> (i32, i32, i32) {
    %c0_i32 = arith.constant 0 : i32
    %c0_i32_0 = arith.constant 0 : i32
    return %arg0, %c0_i32, %arg1 : i32, i32, i32
  }
}

</mosaic_0001>

<bundles_post_ra>
// kernel: tpu_custom_call.1
= control target key start
LH: loop header
LB: loop body
LE: loop exit
PB: predicated region body
PF: predicated region fallthrough
CT: control target
= control target key end

     0   :  { %7 = vsyncpa [#allocation3], 0  ;;  %s1101_s0 = inlined_call_operand.hbm [shape: f32[8,8], index: 0, kind: input, shape index: {}]   ;;  %s1102_s1 = inlined_call_operand.hbm [shape: f32[2,8,256], index: 1, kind: input, shape index: {}]   ;;  %s1103_s2 = inlined_call_operand.hbm [shape: f32[2,8,256], index: 2, kind: output, shape index: {}]  }
   0x1   :  { %8 = vsyncpa [#allocation6], 0 }
   0x2   :  { %10 = vsyncpa [#allocation6 + $0x1], 0 }
   0x3   :  { %11 = vsyncpa [#allocation4], 0 }
   0x4   :  { %13 = vsyncpa [#allocation4 + $0x1], 0  ;;  %s933_s9 = smov 0   ;;  %s935_s10 = smov 0  }
   0x5   :  { %s937_s11 = smov 0   ;;  %s939_s12 = smov 0  }
   0x6   :  { %s941_s13 = smov 0   ;;  %s943_s14 = smov 0  }
   0x7 LB: > { %s669_s15 = sadd.s32 4294967295, %s915_s14   ;;  %s670_s16 = sadd.s32 4294967294, %s915_s14   ;;  %s915_s14 = sphi %s943_s14, %s19_s14   ;;  %s911_s13 = sphi %s941_s13, %s1115_s13   ;;  %s907_s12 = sphi %s939_s12, %s1114_s12   ;;  %s903_s11 = sphi %s937_s11, %s1113_s11   ;;  %s899_s10 = sphi %s935_s10, %s1112_s10   ;;  %s895_s9 = sphi %s933_s9, %s1111_s9  }
   0x8   : > { %p74_p0 = scmp.ne.s32.totalorder %s899_s10, %s895_s9  ;;  %p967_p1 = scmp.eq.s32.totalorder %s669_s15, 0 }
   0x9   : > { %p971_p2 = scmp.eq.s32.totalorder %s669_s15, 1  ;;  %p106_p3 = scmp.eq.s32.totalorder %s670_s16, 1 }
   0xa   : > { %p977_p4 = por %p967_p1, %p74_p0  ;;  %p671_p5 = scmp.ge.s32.totalorder %s915_s14, 1 }
   0xb   : > { %p982_p6 = por %p106_p3, %p74_p0  ;;  %p113_p7 = scmp.lt.s32.totalorder %s915_s14, 3 }
   0xc   : > { %s125_s23 = sshll.u32 %s1101_s0, 4  ;;  %p673_p9 = scmp.ge.s32.totalorder %s915_s14, 2  ;;  %s126_s23 = int_to_ptr.hbm [resolvable:$true] %s125_s23 }
   0xd   : > { %p990_p8 = pnand %p671_p5, %p113_p7  ;;  %s917_s25 = smov [#allocation2]  }
   0xe   : > { %s127_s26 = sshll.u32 %s917_s25, 4  ;;  %s31_s27 = sadd.s32 1, %s911_s13  ;;  %s128_s26 = int_to_ptr.vmem [resolvable:$true] %s127_s26 }
   0xf   : > { %p696_p10 = pneg %p990_p8  ;;  %p33_p12 = scmp.ge.s32.totalorder %s31_s27, 2 }
  0x10   : > { %s61_s28 = sadd.s32 1, %s903_s11  ;;  %p68_p13 = scmp.ne.s32.totalorder %s903_s11, %s899_s10 }
  0x11   : > { %p697_p11 = pnand %p696_p10, %p967_p1  ;;  %p69_p0 = scmp.eq.s32.totalorder %s915_s14, 0 }
  0x12   : > { %s1117_s27 = smov (%p33_p12, %s31_s27), 0  ;;  %p1012_p5 = por %p971_p2, %p68_p13 }
  0x13   : > { %699 = dma.hbm_to_vmem [thread:$0]  (!%p697_p11), %s126_s23, 128, %s128_s26, [#allocation3]  }
  0x14   : > { %p1006_p3 = por %p69_p0, %p68_p13  ;;  %s56_s3 = ssub.s32 %s911_s13, %s1117_s27 }
  0x15   : > { %p709_p7 = scmp.lt.s32.totalorder %s915_s14, 2  ;;  %p59_p10 = scmp.eq.s32.totalorder %s56_s3, 0 }
  0x16   : > { %s138_s4 = sand.u32 1, %s903_s11   ;;  %s686_s7 = sshll.u32 %s911_s13, 4 }
  0x17   : > { %s674_s5 = sshll.u32 %s138_s4, 4  ;;  %s149_s16 = scalar_lea.hbm %s1102_s1, %s686_s7 }
  0x18   : > { %s1021_s6 = scalar_select %p59_p10, %s903_s11, %s61_s28  }
  0x19   : > { %s142_s21 = scalar_lea.vmem [#allocation5], %s674_s5  ;;  %s151_s18 = sshll.u32 %s149_s16, 4  ;;  %s152_s18 = int_to_ptr.hbm [resolvable:$true] %s151_s18 }
  0x1a   : > { %s153_s22 = sshll.u32 %s142_s21, 4  ;;  %p701_p2 = pnand %p709_p7, %p1006_p3  ;;  %s154_s22 = int_to_ptr.vmem [resolvable:$true] %s153_s22 }
  0x1b   : > { %s139_s23 = scalar_lea.sflag [#allocation6], %s138_s4  ;;  %162 = sbr.rel (%p990_p8) target bundleno = 251 (0xfb), region = 28 }
  0x1c   : > { %703 = dma.hbm_to_vmem [thread:$0]  (!%p701_p2), %s152_s18, 256, %s154_s22, %s139_s23  }
  0x20   : > { %882 = dma.done.wait (%p967_p1), [#allocation3], 128  }
  0x21   : > { %884 = vsyncadd (%p967_p1), [#allocation3], 4294967168  ;;  %s1036_s25 = sand.u32 1, %s899_s10  }
  0x22   : > { %s679_s26 = sshll.u32 %s1036_s25, 4  ;;  %s170_s28 = scalar_lea.sflag [#allocation6], %s1036_s25 }
  0x23   : > { %s173_s29 = scalar_lea.vmem [#allocation5], %s679_s26 }
  0x24   : > { %886 = dma.done.wait (%p977_p4), %s170_s28, 256  }
  0x25   : > { %888 = vsyncadd (%p977_p4), %s170_s28, 4294967040  ;;  %vm202_vm0 = vcmask 64512   ;;  %v1046_v0 = vld [vmem:[%s173_s29] sm:$0xff]  ;;  %v201_v1 = vld [vmem:[#allocation2] sm:$0xff]  ;;  %s194_s17 = scalar_lea.vmem [#allocation7], %s679_s26  ;;  %s687_s19 = sshll.u32 %s907_s12, 4 }
  0x26   : > { %v1048_v2 = vld [vmem:[%s173_s29 + $0x8] sm:$0xff]  ;;  %v199_v3 = vmul.f32 %v1046_v0, %v1046_v0  ;;  %v204_v4 = vsel %vm202_vm0, %v201_v1, 0  ;;  %s568_s4 = scalar_lea.hbm %s1103_s2, %s687_s19  ;;  %s570_s5 = sshll.u32 %s194_s17, 4  ;;  %s571_s5 = int_to_ptr.vmem [resolvable:$true] %s570_s5 }
  0x27   : > { %v1054_v5 = vmul.f32 %v1048_v2, %v1048_v2  ;;  %v223_v6 = vand.u32 4294901760, %v204_v4  ;;  %s572_s7 = sshll.u32 %s568_s4, 4  ;;  %s555_s12 = scalar_lea.sflag [#allocation4], %s1036_s25  ;;  %s573_s7 = int_to_ptr.hbm [resolvable:$true] %s572_s7 }
  0x28   : > { %v221_v7 = vand.u32 4294901760, %v199_v3  ;;  %s843_s8 = sshra.s32 %s573_s7, 4  ;;  %s849_s22 = scalar_lea.hbm %s1103_s2, 32  ;;  %s844_s8 = int_to_ptr.hbm [resolvable:$true] %s843_s8 }
  0x29   : > { %v367_v8 = vand.u32 4294901760, %v1054_v5  ;;  %v224_v9 = vsub.f32 %v204_v4, %v223_v6  ;;  %s845_s15 = scalar_lea.hbm %s844_s8, 16  ;;  %p850_p11 = scmp.lt.s32.totalorder %s844_s8, %s1103_s2 }
  0x2a   : > { %v248_v10 = vsub.f32 %v199_v3, %v221_v7  ;;  %298 = vmatpush.msra.mxu3 %v221_v7  ;;  %222 = vmatpush.msra.mxu0 %v221_v7  ;;  %p846_p1 = scmp.ne.s32.totalorder %s844_s8, %s845_s15  ;;  %p851_p12 = scmp.lt.s32.totalorder %s849_s22, %s845_s15 }
  0x2b   : > { %v394_v11 = vsub.f32 %v1054_v5, %v367_v8  ;;  %v225_v12 = vand.u32 4294901760, %v224_v9 }
  0x2c   : > { %275 = vmatpush.msra.mxu2 %v248_v10  ;;  %v249_v13 = vand.u32 4294901760, %v248_v10  ;;  %p847_p4 = pnand %p846_p1, %p1012_p5  ;;  %p852_p13 = por %p851_p12, %p850_p11 }
  0x2d   : > { %v395_v14 = vand.u32 4294901760, %v394_v11  ;;  %278 = vmatmul.f32.vlgmr.msra.gmra.mxu2 %v224_v9  ;;  %302 = vmatmul.f32.vlgmr.msra.gmra.mxu3 %v225_v12  ;;  %v226_v15 = vsub.f32 %v224_v9, %v225_v12 }
  0x2e   : > { %368 = vmatpush.msrb.mxu2 %v367_v8  ;;  %v250_v16 = vsub.f32 %v248_v10, %v249_v13  ;;  %324 = vmatpush.msrb.mxu0 %v249_v13  ;;  %p848_p8 = pneg %p847_p4 }
  0x2f   : > { %v396_v17 = vsub.f32 %v394_v11, %v395_v14  ;;  %v227_v18 = vand.u32 4294901760, %v226_v15 }
  0x30   : > { %470 = vmatpush.msra.mxu2 %v395_v14  ;;  %v251_v19 = vand.u32 4294901760, %v250_v16  ;;  %p853_p0 = pnand %p852_p13, %p848_p8 }
  0x31   : > { %v397_v20 = vand.u32 4294901760, %v396_v17  ;;  %228 = vmatmul.f32.vlgmr.msra.gmra.mxu0 %v227_v18 }
  0x32   : > { %252 = vmatpush.msra.mxu1 %v251_v19  ;;  %421 = vmatpush.msra.mxu0 %v394_v11 }
  0x33   : > { %398 = vmatpush.msrb.mxu3 %v397_v20  ;;  %254 = vmatmul.f32.vlgmr.msra.gmra.mxu1 %v223_v6 }
  0x34   : > { %346 = vmatpush.msrb.mxu1 %v221_v7 }
  0x35   : > { %492 = vmatpush.msra.mxu3 %v367_v8  ;;  %374 = vmatmul.f32.vlgmr.msrb.gmra.mxu2 %v227_v18 }
  0x36   : > { %400 = vmatmul.f32.vlgmr.msrb.gmra.mxu3 %v223_v6  ;;  %444 = vmatpush.msra.mxu1 %v367_v8 }
  0x39   : > { %326 = vmatmul.f32.vlgmr.msrb.gmra.mxu0 %v223_v6 }
  0x3b   : > { %348 = vmatmul.f32.vlgmr.msrb.gmra.mxu1 %v223_v6 }
  0x3d   : > { %472 = vmatmul.f32.vlgmr.msra.gmra.mxu2 %v223_v6 }
  0x3e   : > { %494 = vmatmul.f32.vlgmr.msra.gmra.mxu3 %v223_v6 }
  0x41   : > { %424 = vmatmul.f32.vlgmr.msra.gmra.mxu0 %v224_v9 }
  0x43   : > { %448 = vmatmul.f32.vlgmr.msra.gmra.mxu1 %v225_v12 }
  0xae   : > { %v229_v21 = vpop.f32.mrf.mxu0 }
  0xb0   : > { %v255_v22 = vpop.f32.mrf.mxu1  ;;  %v279_v23 = vpop.f32.mrf.mxu2 }
  0xb1   : > { %v256_v24 = vadd.f32 %v255_v22, %v229_v21  ;;  %v303_v25 = vpop.f32.mrf.mxu3 }
  0xb3   : > { %v280_v26 = vadd.f32 %v279_v23, %v256_v24 }
  0xb5   : > { %v304_v27 = vadd.f32 %v303_v25, %v280_v26 }
  0xb6   : > { %v327_v28 = vpop.f32.mrf.mxu0 }
  0xb7   : > { %v328_v29 = vadd.f32 %v327_v28, %v304_v27 }
  0xb8   : > { %v349_v30 = vpop.f32.mrf.mxu1  ;;  %v375_v31 = vpop.f32.mrf.mxu2 }
  0xb9   : > { %v350_v32 = vadd.f32 %v349_v30, %v328_v29  ;;  %v401_v33 = vpop.f32.mrf.mxu3 }
  0xba   : > { %v402_v36 = vadd.f32 %v401_v33, %v375_v31 }
  0xbb   : > { %v498_v34 = vadd.f32 %v350_v32, %v199_v3 }
  0xbd   : > { %v500_v35 = vmul.f32 2e-05, %v498_v34 }
  0xbe   : > { %v425_v37 = vpop.f32.mrf.mxu0 }
  0xbf   : > { %v502_v38 = vadd.f32 1.0, %v500_v35  ;;  %v426_v39 = vadd.f32 %v425_v37, %v402_v36 }
  0xc0   : > { %v449_v40 = vpop.f32.mrf.mxu1  ;;  %v473_v41 = vpop.f32.mrf.mxu2 }
  0xc1   : > { %761 = vrsqrt.f32 %v502_v38  ;;  %v450_v42 = vadd.f32 %v449_v40, %v426_v39  ;;  %v495_v43 = vpop.f32.mrf.mxu3  ;;  %vm510_vm2 = vweird.f32 %v502_v38 }
  0xc3   : > { %v474_v44 = vadd.f32 %v473_v41, %v450_v42 }
  0xc5   : > { %v496_v45 = vadd.f32 %v495_v43, %v474_v44 }
  0xc7   : > { %v762_v46 = vpop.eup %761  ;;  %v499_v47 = vadd.f32 %v496_v45, %v1054_v5 }
  0xc8   : > { %v505_v48 = vmul.f32 %v762_v46, %v502_v38  ;;  %vm511_vm1 = vweird.f32 %v762_v46 }
  0xc9   : > { %v501_v49 = vmul.f32 2e-05, %v499_v47  ;;  %vm512_vm3 = vmor %vm510_vm2, %vm511_vm1 }
  0xca   : > { %v506_v50 = vmul.f32 %v762_v46, %v505_v48 }
  0xcb   : > { %v503_v51 = vadd.f32 1.0, %v501_v49 }
  0xcc   : > { %v507_v52 = vmul.f32 0.5, %v506_v50 }
  0xcd   : > { %763 = vrsqrt.f32 %v503_v51  ;;  %vm520_vm5 = vweird.f32 %v503_v51 }
  0xce   : > { %v508_v53 = vsub.f32 1.5, %v507_v52 }
  0xd0   : > { %v509_v54 = vmul.f32 %v762_v46, %v508_v53 }
  0xd2   : > { %v513_v55 = vsel %vm512_vm3, %v762_v46, %v509_v54 }
  0xd3   : > { %v764_v56 = vpop.eup %763  ;;  %765 = vrsqrt.f32 %v513_v55  ;;  %vm531_vm7 = vcmp.eq.f32.partialorder %v513_v55, inf  ;;  %v534_v9 = vand.u32 2147483648, %v513_v55  ;;  %vm533_vm8 = vcmp.eq.f32.partialorder %v513_v55, 0.0 }
  0xd4   : > { %v515_v57 = vmul.f32 %v764_v56, %v503_v51  ;;  %vm521_vm4 = vweird.f32 %v764_v56 }
  0xd5   : > { %vm522_vm6 = vmor %vm520_vm5, %vm521_vm4 }
  0xd6   : > { %v516_v58 = vmul.f32 %v764_v56, %v515_v57 }
  0xd8   : > { %v517_v59 = vmul.f32 0.5, %v516_v58 }
  0xd9   : > { %v766_v60 = vpop.eup %765 }
  0xda   : > { %v525_v61 = vmul.f32 %v766_v60, %v513_v55  ;;  %v518_v62 = vsub.f32 1.5, %v517_v59 }
  0xdc   : > { %v519_v63 = vmul.f32 %v764_v56, %v518_v62  ;;  %v526_v1 = vmul.f32 %v766_v60, %v525_v61 }
  0xde   : > { %v523_v3 = vsel %vm522_vm6, %v764_v56, %v519_v63  ;;  %v527_v4 = vmul.f32 0.5, %v526_v1 }
  0xdf   : > { %767 = vrsqrt.f32 %v523_v3  ;;  %vm543_vm9 = vcmp.eq.f32.partialorder %v523_v3, inf  ;;  %v546_v20 = vand.u32 2147483648, %v523_v3  ;;  %vm545_vm10 = vcmp.eq.f32.partialorder %v523_v3, 0.0 }
  0xe0   : > { %v528_v5 = vsub.f32 1.5, %v527_v4 }
  0xe2   : > { %v529_v6 = vmul.f32 %v766_v60, %v528_v5 }
  0xe4   : > { %v530_v7 = vmul.f32 %v529_v6, %v513_v55 }
  0xe5   : > { %v768_v8 = vpop.eup %767 }
  0xe6   : > { %v537_v10 = vmul.f32 %v768_v8, %v523_v3  ;;  %v532_v11 = vsel %vm531_vm7, %v513_v55, %v530_v7 }
  0xe7   : > { %v535_v12 = vsel %vm533_vm8, %v534_v9, %v532_v11 }
  0xe8   : > { %v538_v13 = vmul.f32 %v768_v8, %v537_v10  ;;  %v548_v14 = vmul.f32 %v535_v12, %v513_v55 }
  0xea   : > { %v539_v15 = vmul.f32 0.5, %v538_v13  ;;  %v550_v16 = vmul.f32 %v548_v14, %v1046_v0 }
  0xec   : > { %v540_v17 = vsub.f32 1.5, %v539_v15  ;;  %552 = vst [vmem:[%s194_s17] sm:$0xff] %v550_v16 }
  0xee   : > { %v541_v18 = vmul.f32 %v768_v8, %v540_v17 }
  0xf0   : > { %v542_v19 = vmul.f32 %v541_v18, %v523_v3 }
  0xf2   : > { %v544_v21 = vsel %vm543_vm9, %v523_v3, %v542_v19 }
  0xf3   : > { %v547_v22 = vsel %vm545_vm10, %v546_v20, %v544_v21 }
  0xf4   : > { %v549_v0 = vmul.f32 %v547_v22, %v523_v3 }
  0xf6   : > { %v551_v23 = vmul.f32 %v549_v0, %v1048_v2 }
  0xf8   : > { %553 = vst [vmem:[%s194_s17 + $0x8] sm:$0xff] %v551_v23 }
  0xf9   : > { %856 = shalt.err (!%p853_p0)
}
  0xfa   : > { %694 = dma.vmem_to_hbm [thread:$0]  (%p1012_p5), %s571_s5, 256, %s573_s7, %s555_s12  }
  0xfb PF: > { %s584_s25 = sand.u32 1, %s895_s9   ;;  %p705_p3 = pnand %p673_p9, %p982_p6 }
  0xfc   : > { %s585_s26 = scalar_lea.sflag [#allocation4], %s584_s25 }
  0xfd   : > { %p706_p7 = pneg %p705_p3 }
  0xff   : > { %890 = dma.done.wait (%p706_p7), %s585_s26, 256  }
 0x100   : > { %892 = vsyncadd (%p706_p7), %s585_s26, 4294967040  ;;  %s19_s14 = sadd.s32 1, %s915_s14   ;;  %s1111_s9 = smov %s899_s10 }
 0x101   : > { %p16_p10 = scmp.ge.s32.totalorder %s19_s14, 4   ;;  %s1112_s10 = smov %s903_s11 }
 0x102   : > { %s1113_s11 = smov %s1021_s6  ;;  %s1114_s12 = smov %s911_s13 }
 0x103   : > { %s1115_s13 = smov %s1117_s27  ;;  %18 = sbr.rel (!%p16_p10) target bundleno = 7 (0x7), region = 78 }
 0x108   :  { %591 = vsyncpa [#allocation3], 1 }
 0x109   :  { %593 = vsyncpa [#allocation3 + $0x1], 1 }
 0x10a   :  { %594 = vsyncpa [#allocation6], 1 }
 0x10b   :  { %596 = vsyncpa [#allocation6 + $0x1], 1 }
 0x10c   :  { %597 = vsyncpa [#allocation4], 1 }
 0x10d   :  { %599 = vsyncpa [#allocation4 + $0x1], 1 }

</bundles_post_ra>
